<compile_context>
chip_gen: v6e
topology: v6e:2x2x1
jax: 0.10.0
libtpu: 0.0.40
codegen_flags: <defaults>
</compile_context>

<pallas_src>
import jax
import jax.numpy as jnp
from jax.experimental import pallas as pl
from jax.experimental.pallas import tpu as pltpu


_VMEM_LIMIT_BYTES = 32 * 1024 * 1024        # safe on v5e/v6e (128 MiB) and v7x (64 MiB)
_FUSED_WORKING_SET_BUDGET = 16 * 1024 * 1024
_MAX_UNROLLED_CHANNELS = 256                # cap on statically unrolled row stores


def _round_up(a, b):
    return (a + b - 1) // b * b


def _fused_bytes(nb, C, HW, itemsize):
    """Conservative double-buffered VMEM working-set estimate for the fused path."""
    # input block (nb, C, HW): sublane-pad C to 8, lane-pad HW to 128
    in_bytes = 2 * nb * _round_up(C, 8) * _round_up(HW, 128) * itemsize
    # output block (nb, C*HW): sublane-pad nb to 8, lane-pad C*HW to 128
    out_bytes = 2 * _round_up(nb, 8) * _round_up(C * HW, 128) * itemsize
    return in_bytes + out_bytes


def _pick_batch_block(N, C, HW, itemsize):
    """Largest safe batch block for the fused path, or None if it can't fit."""
    if C > _MAX_UNROLLED_CHANNELS:
        return None
    # Candidates keep the output block's sublane dim either == N or a multiple
    # of 8 (or 1, which lowers to a masked-but-correct store).
    for nb in (N, 32, 16, 8, 1):
        if nb <= N and N % nb == 0 and _fused_bytes(nb, C, HW, itemsize) <= _FUSED_WORKING_SET_BUDGET:
            return nb
    return None


def _shuffle_fused(x3, groups, nb):
    """x3: (N, C, HW) -> (N, C*HW), nb batch rows resident per grid step.

    The whole (nb, C, HW) slab is in VMEM; the channel permutation is done
    with C lane-contiguous row stores into the flat output block.
    """
    N, C, HW = x3.shape
    cpg = C // groups

    def kernel(x_ref, o_ref):
        # x_ref: (nb, C, HW)   o_ref: (nb, C*HW)
        for out_c in range(C):
            i = out_c // groups
            j = out_c % groups
            src_c = j * cpg + i
            # full-lane, contiguous store of one shuffled channel row (all nb images)
            o_ref[:, pl.ds(out_c * HW, HW)] = x_ref[:, src_c, :]

    return pl.pallas_call(
        kernel,
        out_shape=jax.ShapeDtypeStruct((N, C * HW), x3.dtype),
        grid=(N // nb,),
        in_specs=[pl.BlockSpec((nb, C, HW), lambda n: (n, 0, 0))],
        out_specs=pl.BlockSpec((nb, C * HW), lambda n: (n, 0)),
        compiler_params=pltpu.CompilerParams(
            dimension_semantics=("parallel",),
            vmem_limit_bytes=_VMEM_LIMIT_BYTES,
        ),
    )(x3)


def _shuffle_per_channel(x3, groups):
    """Fallback for large C*HW: one lane-dense channel plane per grid step.

    The permutation lives entirely in the input index_map (source-channel
    selection); the kernel body is a pure copy, so Pallas pipelining turns
    this into back-to-back contiguous DMAs.
    """
    N, C, HW = x3.shape
    cpg = C // groups

    def kernel(x_ref, o_ref):
        # x_ref: (1, 1, HW)  o_ref: (1, HW)
        o_ref[...] = x_ref[0]

    def in_index_map(n, c):
        # output channel c <- input channel (c % g)*cpg + c//g
        return (n, (c % groups) * cpg + (c // groups), 0)

    def out_index_map(n, c):
        return (n, c)

    return pl.pallas_call(
        kernel,
        out_shape=jax.ShapeDtypeStruct((N, C * HW), x3.dtype),
        grid=(N, C),
        in_specs=[pl.BlockSpec((1, 1, HW), in_index_map)],
        out_specs=pl.BlockSpec((1, HW), out_index_map),
        compiler_params=pltpu.CompilerParams(
            dimension_semantics=("parallel", "parallel"),
            vmem_limit_bytes=_VMEM_LIMIT_BYTES,
        ),
    )(x3)


def channel_shuffle_flatten(x, groups):
    """x: (N, C, H, W) NCHW.  Returns (N, C*H*W) after channel shuffle + flatten."""
    N, C, H, W = x.shape
    assert C % groups == 0, "channels must be divisible by groups"
    HW = H * W

    # Lane-dense view: last dim is H*W (contiguous flatten of the spatial dims).
    x3 = x.reshape(N, C, HW)

    nb = _pick_batch_block(N, C, HW, x.dtype.itemsize)
    if nb is not None:
        return _shuffle_fused(x3, groups, nb)
    return _shuffle_per_channel(x3, groups)


def _reference(x, groups):
    N, C, H, W = x.shape
    cpg = C // groups
    y = x.reshape(N, groups, cpg, H, W)
    y = jnp.transpose(y, (0, 2, 1, 3, 4))
    y = y.reshape(N, C, H, W)
    return y.reshape(N, C * H * W)


if __name__ == "__main__":
    key = jax.random.PRNGKey(0)
    N, C, H, W = 2, 4, 16, 16
    groups = 2

    x = jax.random.normal(key, (N, C, H, W), dtype=jnp.float32)

    out = channel_shuffle_flatten(x, groups)
    out = jax.block_until_ready(out)

    ref = _reference(x, groups)
    assert out.shape == (N, C * H * W)
    assert jnp.array_equal(out, ref), "mismatch vs reference channel shuffle"

    # also exercise the per-channel fallback path for coverage
    out_fb = jax.block_until_ready(_shuffle_per_channel(x.reshape(N, C, H * W), groups))
    assert jnp.array_equal(out_fb, ref), "fallback path mismatch"

    print("KERNEL_OK")
</pallas_src>

<mosaic_0001>
module attributes {stable_mosaic.version = 11 : i64} {
  func.func @kernel(%arg0: i32, %arg1: memref<2x4x256xf32, #tpu.memory_space<vmem>>, %arg2: memref<2x1024xf32, #tpu.memory_space<vmem>>) attributes {dimension_semantics = [#tpu.dimension_semantics<parallel>], iteration_bounds = array<i64: 1>, scalar_prefetch = 0 : i64, scratch_operands = 0 : i64, tpu.core_type = #tpu.core_type<tc>, window_params = [{transform_indices = @transform_0, window_bounds = array<i64: 2, 4, 256>}, {transform_indices = @transform_1, window_bounds = array<i64: 2, 1024>}]} {
    %c0 = arith.constant 0 : index
    %c0_0 = arith.constant 0 : index
    %c0_1 = arith.constant 0 : index
    %0 = vector.load %arg1[%c0, %c0_0, %c0_1] : memref<2x4x256xf32, #tpu.memory_space<vmem>>, vector<2x1x256xf32>
    %1 = vector.shape_cast %0 : vector<2x1x256xf32> to vector<2x256xf32>
    %c0_2 = arith.constant 0 : index
    %c0_3 = arith.constant 0 : index
    %2 = vector.load %arg2[%c0_2, %c0_3] : memref<2x1024xf32, #tpu.memory_space<vmem>>, vector<2x256xf32>
    tpu.vector_store %arg2[%c0_2, %c0_3], %1 {strides = array<i32>} : memref<2x1024xf32, #tpu.memory_space<vmem>>, vector<2x256xf32>,
    %c0_4 = arith.constant 0 : index
    %c2 = arith.constant 2 : index
    %c0_5 = arith.constant 0 : index
    %3 = vector.load %arg1[%c0_4, %c2, %c0_5] : memref<2x4x256xf32, #tpu.memory_space<vmem>>, vector<2x1x256xf32>
    %4 = vector.shape_cast %3 : vector<2x1x256xf32> to vector<2x256xf32>
    %c0_6 = arith.constant 0 : index
    %c256 = arith.constant 256 : index
    %5 = vector.load %arg2[%c0_6, %c256] : memref<2x1024xf32, #tpu.memory_space<vmem>>, vector<2x256xf32>
    tpu.vector_store %arg2[%c0_6, %c256], %4 {strides = array<i32>} : memref<2x1024xf32, #tpu.memory_space<vmem>>, vector<2x256xf32>,
    %c0_7 = arith.constant 0 : index
    %c1 = arith.constant 1 : index
    %c0_8 = arith.constant 0 : index
    %6 = vector.load %arg1[%c0_7, %c1, %c0_8] : memref<2x4x256xf32, #tpu.memory_space<vmem>>, vector<2x1x256xf32>
    %7 = vector.shape_cast %6 : vector<2x1x256xf32> to vector<2x256xf32>
    %c0_9 = arith.constant 0 : index
    %c512 = arith.constant 512 : index
    %8 = vector.load %arg2[%c0_9, %c512] : memref<2x1024xf32, #tpu.memory_space<vmem>>, vector<2x256xf32>
    tpu.vector_store %arg2[%c0_9, %c512], %7 {strides = array<i32>} : memref<2x1024xf32, #tpu.memory_space<vmem>>, vector<2x256xf32>,
    %c0_10 = arith.constant 0 : index
    %c3 = arith.constant 3 : index
    %c0_11 = arith.constant 0 : index
    %9 = vector.load %arg1[%c0_10, %c3, %c0_11] : memref<2x4x256xf32, #tpu.memory_space<vmem>>, vector<2x1x256xf32>
    %10 = vector.shape_cast %9 : vector<2x1x256xf32> to vector<2x256xf32>
    %c0_12 = arith.constant 0 : index
    %c768 = arith.constant 768 : index
    %11 = vector.load %arg2[%c0_12, %c768] : memref<2x1024xf32, #tpu.memory_space<vmem>>, vector<2x256xf32>
    tpu.vector_store %arg2[%c0_12, %c768], %10 {strides = array<i32>} : memref<2x1024xf32, #tpu.memory_space<vmem>>, vector<2x256xf32>,
    return
  }
  func.func @transform_0(%arg0: i32) -> (i32, i32, i32) {
    %c0_i32 = arith.constant 0 : i32
    %c0_i32_0 = arith.constant 0 : i32
    %c0_i32_1 = arith.constant 0 : i32
    return %arg0, %c0_i32, %c0_i32_0 : i32, i32, i32
  }
  func.func @transform_1(%arg0: i32) -> (i32, i32) {
    %c0_i32 = arith.constant 0 : i32
    %c0_i32_0 = arith.constant 0 : i32
    return %arg0, %c0_i32 : i32, i32
  }
}

</mosaic_0001>

<bundles_post_ra>
// kernel: tpu_custom_call.1
= control target key start
LH: loop header
LB: loop body
LE: loop exit
PB: predicated region body
PF: predicated region fallthrough
CT: control target
= control target key end

     0   :  { %6 = vsyncpa [#allocation3], 0  ;;  %s173_s0 = inlined_call_operand.hbm [shape: f32[2,4,256], index: 0, kind: input, shape index: {}]   ;;  %s174_s1 = inlined_call_operand.hbm [shape: f32[2,1024], index: 1, kind: output, shape index: {}]  }
   0x1   :  { %7 = vsyncpa [#allocation4], 0  ;;  %s153_s6 = smov [#allocation2]  }
   0x2   :  { %s13_s7 = sshll.u32 %s153_s6, 4  ;;  %s14_s7 = int_to_ptr.vmem [resolvable:$true] %s13_s7 }
   0x3   :  { %s117_s8 = scalar_lea.vmem %s14_s7, 256  ;;  %p122_p1 = scmp.lt.s32.totalorder %s14_s7, %s14_s7 }
   0x4   :  { %p118_p0 = scmp.ne.s32.totalorder %s14_s7, %s117_s8  ;;  %p123_p2 = scmp.lt.s32.totalorder %s117_s8, %s117_s8 }
   0x6   :  { %p124_p3 = por %p123_p2, %p122_p1 }
   0x8   :  { %p125_p4 = pnand %p124_p3, %p118_p0 }
   0xa   :  { %128 = shalt.err (!%p125_p4)
}
   0xb   :  { %s154_s9 = smov 128   ;;  %s155_s10 = smov 8  }
   0xc   :  { %19 = dma.hbm_to_vmem [thread:$0]  %s173_s0, 256, %s14_s7, [#allocation3], %s154_s9, %s154_s9, %s155_s10  }
   0xd   :  { %149 = dma.done.wait [#allocation3], 256  }
   0xe   :  { %150 = vsyncadd [#allocation3], 4294967040  ;;  %s156_s13 = smov [#allocation5]   ;;  %v23_v0 = vld [vmem:[#allocation2] ss:$4 sm:$0x3] }
   0xf   :  { %s92_s14 = sshll.u32 %s156_s13, 4  ;;  %v25_v1 = vld [vmem:[#allocation2 + $0x8] ss:$4 sm:$0x3]  ;;  %s93_s14 = int_to_ptr.vmem [resolvable:$true] %s92_s14 }
  0x10   :  { %v28_v2 = vcombine.low %v23_v0, %v25_v1  ;;  %v39_v3 = vld [vmem:[#allocation2 + $0x2] ss:$4 sm:$0x3]  ;;  %v41_v4 = vld [vmem:[#allocation2 + $0xa] ss:$4 sm:$0x3]  ;;  %p134_p6 = scmp.lt.s32.totalorder %s93_s14, %s93_s14 }
  0x11   :  { %v44_v5 = vcombine.low %v39_v3, %v41_v4  ;;  %v55_v6 = vld [vmem:[#allocation2 + $0x1] ss:$4 sm:$0x3]  ;;  %v57_v7 = vld [vmem:[#allocation2 + $0x9] ss:$4 sm:$0x3] }
  0x12   :  { %101 = vst.sshfl [vmem:[#allocation5] sm:$0x33 pattern:$0x75316420] %v28_v2  ;;  %v60_v8 = vcombine.low %v55_v6, %v57_v7  ;;  %s129_s0 = scalar_lea.vmem %s93_s14, 256 }
  0x13   :  { %v71_v9 = vld [vmem:[#allocation2 + $0x3] ss:$4 sm:$0x3]  ;;  %v73_v10 = vld [vmem:[#allocation2 + $0xb] ss:$4 sm:$0x3]  ;;  %p130_p5 = scmp.ne.s32.totalorder %s93_s14, %s129_s0  ;;  %p135_p7 = scmp.lt.s32.totalorder %s129_s0, %s129_s0 }
  0x14   :  { %102 = vst.sshfl [vmem:[#allocation5 + $0x4] sm:$0x33 pattern:$0x75316420] %v44_v5  ;;  %v76_v11 = vcombine.low %v71_v9, %v73_v10 }
  0x15   :  { %103 = vst.sshfl [vmem:[#allocation5 + $0x8] sm:$0x33 pattern:$0x75316420] %v60_v8  ;;  %p136_p8 = por %p135_p7, %p134_p6 }
  0x16   :  { %104 = vst.sshfl [vmem:[#allocation5 + $0xc] sm:$0x33 pattern:$0x75316420] %v76_v11 }
  0x17   :  { %p137_p9 = pnand %p136_p8, %p130_p5 }
  0x19   :  { %140 = shalt.err (!%p137_p9)
}
  0x1a   :  { %95 = dma.vmem_to_hbm [thread:$0]  %s93_s14, 256, %s174_s1, [#allocation4]  }
  0x1b   :  { %151 = dma.done.wait [#allocation4], 256  }
  0x1c   :  { %152 = vsyncadd [#allocation4], 4294967040 }
  0x1d   :  { %99 = vsyncpa [#allocation3], 1 }
  0x1e   :  { %100 = vsyncpa [#allocation4], 1 }

</bundles_post_ra>
